<compile_context>
chip_gen: v7x
topology: tpu7x:2x2x1
jax: 0.10.0
libtpu: 0.0.40
codegen_flags: <defaults>
</compile_context>

<pallas_src>
import functools

import jax
import jax.numpy as jnp
from jax.experimental import pallas as pl
from jax.experimental.pallas import tpu as pltpu


def _to_even(n):
    return n if n % 2 == 0 else n - 1


def _round_up(n, m):
    return ((n + m - 1) // m) * m


def _cdiv(a, b):
    return -(-a // b)


# ---------------------------------------------------------------------------
# Pallas kernel: both filtfilt passes for one block of rows.
# ---------------------------------------------------------------------------
def _filtfilt_kernel(w_ref, x_ref, lh_ref, rh_ref, o_ref, xp_ref,
                     *, K, ext, left, L, Lp):
    # w_ref : SMEM (1, K)       filter taps (scalar reads -> vreg splats)
    # x_ref : VMEM (RB, L)      original signal rows (no wrapper copies)
    # lh_ref: VMEM (RB, ext)    left reflected halo  (pre-flipped, tiny)
    # rh_ref: VMEM (RB, ext)    right reflected halo (pre-flipped, tiny)
    # o_ref : VMEM (RB, Lp)     lane-dense output (Lp = round_up(L, 128))
    # xp_ref: VMEM (RB, W)      scratch: [zeros(left) | lh | x | rh | zeros]
    W = Lp + 2 * (K - 1)          # assembled signal width
    Lmid = Lp + K - 1             # pass-1 intermediate width
    rb = x_ref.shape[0]
    sig_end = left + 2 * ext + L  # end of the reflection-extended signal

    # ---- assemble the zero-padded, reflection-extended signal once in VMEM -
    if left > 0:
        xp_ref[:, 0:left] = jnp.zeros((rb, left), jnp.float32)
    xp_ref[:, left:left + ext] = lh_ref[...].astype(jnp.float32)
    xp_ref[:, left + ext:left + ext + L] = x_ref[...].astype(jnp.float32)
    xp_ref[:, left + ext + L:sig_end] = rh_ref[...].astype(jnp.float32)
    if W - sig_end > 0:
        xp_ref[:, sig_end:W] = jnp.zeros((rb, W - sig_end), jnp.float32)

    xp = xp_ref[...]

    # ---- pass 1: depthwise cross-correlation with w, 'same' zero padding ---
    # y1[i] = sum_k w[k] * xp[i + k]   (value stays resident; no scratch store)
    y1 = w_ref[0, 0] * xp[:, 0:Lmid]
    for k in range(1, K):             # static unrolled tap loop
        y1 = y1 + w_ref[0, k] * xp[:, k:k + Lmid]

    # ---- pass 2: flip -> conv -> flip == cross-correlation with flip(w) ----
    # With the [ext:-ext] crop folded in:
    #   out[j] = sum_m w[K-1-m] * y1[j + m],  j in [0, Lp)
    acc = w_ref[0, K - 1] * y1[:, 0:Lp]
    for m in range(1, K):
        acc = acc + w_ref[0, K - 1 - m] * y1[:, m:m + Lp]

    o_ref[...] = acc.astype(o_ref.dtype)


# ---------------------------------------------------------------------------
# Wrapper: row flattening, tiny edge-halo prep, row-block sizing, crop.
# ---------------------------------------------------------------------------
def base_filter1d_forward(x, kernel_w, *, max_row_block=512,
                          vmem_budget_bytes=24 * 1024 * 1024):
    """x: (batch, n_chs, seq_len). kernel_w: (K,), K >= 2 (odd or even)."""
    # TODO(synk): ezdsp.ensure_3d (rank normalization) is assumed done by the
    # caller; this wrapper requires a 3-D (B, C, L) input.
    B, C, L = x.shape
    K = int(kernel_w.shape[-1])
    assert K >= 2, "BaseFilter1D Pallas kernel requires a filter length >= 2"
    ext = _to_even(K) // 2            # reflection radius (torch module)
    left = (K - 1) // 2               # 'same' left zero pad (torch & XLA)
    assert 0 < ext <= L, "reflection radius must not exceed seq_len"

    Lp = _round_up(L, 128)            # lane-dense stored output width
    W = Lp + 2 * (K - 1)              # assembled signal width (scratch)
    Lmid = Lp + K - 1                 # pass-1 intermediate width

    rows = B * C
    xr = x.reshape(rows, L)                     # free collapse, no copy
    lh = xr[:, :ext][:, ::-1]                   # tiny reflected halos
    rh = xr[:, L - ext:][:, ::-1]               # (rows, ext) each

    # ---- pick the largest row block that fits the VMEM budget --------------
    # bytes/row: double-buffered in/out tiles + xp scratch + y1 + acc (f32)
    per_row_bytes = 4 * (2 * L + 2 * Lp + W + Lmid + Lp)
    rb = max(8, min(max_row_block,
                    (vmem_budget_bytes // per_row_bytes) // 8 * 8))
    rb = min(rb, _round_up(rows, 8))
    nblk = _cdiv(rows, rb)
    rb = _round_up(_cdiv(rows, nblk), 8)        # minimize row over-padding
    rows_p = rb * nblk
    # NOTE: for very long sequences a second (seq-tiled, K-1 halo) grid axis
    # would bound the working set further; whole-row tiles suffice here.

    if rows_p != rows:
        pad = rows_p - rows
        xr = jnp.pad(xr, ((0, pad), (0, 0)))
        lh = jnp.pad(lh, ((0, pad), (0, 0)))
        rh = jnp.pad(rh, ((0, pad), (0, 0)))

    w2 = kernel_w.reshape(1, K).astype(jnp.float32)

    kern = functools.partial(_filtfilt_kernel, K=K, ext=ext, left=left,
                             L=L, Lp=Lp)
    out = pl.pallas_call(
        kern,
        out_shape=jax.ShapeDtypeStruct((rows_p, Lp), x.dtype),
        grid_spec=pltpu.PrefetchScalarGridSpec(
            num_scalar_prefetch=0,
            grid=(nblk,),
            in_specs=[
                pl.BlockSpec(memory_space=pltpu.MemorySpace.SMEM),    # taps
                pl.BlockSpec((rb, L), lambda i: (i, 0)),              # signal
                pl.BlockSpec((rb, ext), lambda i: (i, 0)),            # left halo
                pl.BlockSpec((rb, ext), lambda i: (i, 0)),            # right halo
            ],
            out_specs=pl.BlockSpec((rb, Lp), lambda i: (i, 0)),
            scratch_shapes=[pltpu.VMEM((rb, W), jnp.float32)],
        ),
        compiler_params=pltpu.CompilerParams(
            dimension_semantics=("parallel",),
            vmem_limit_bytes=48 * 1024 * 1024,
        ),
    )(w2, xr, lh, rh)

    return out[:rows, :L].reshape(B, C, L)


# ---------------------------------------------------------------------------
# Pure-JAX reference (mirrors the PyTorch forward exactly) for verification
# ---------------------------------------------------------------------------
def _ref_forward(x, kernel_w):
    B, C, L = x.shape
    K = int(kernel_w.shape[-1])
    ext = _to_even(K) // 2
    first = x[:, :, :ext][..., ::-1]
    last = x[:, :, L - ext:][..., ::-1]
    xe = jnp.concatenate([first, x, last], axis=-1)
    kern = jnp.broadcast_to(kernel_w.reshape(1, 1, K), (C, 1, K)).astype(x.dtype)

    def conv(a):  # depthwise cross-correlation, 'same' padding
        return jax.lax.conv_general_dilated(
            a, kern, window_strides=(1,), padding="SAME",
            feature_group_count=C, dimension_numbers=("NCH", "OIH", "NCH"))

    y1 = conv(xe)
    y2 = jnp.flip(conv(jnp.flip(y1, -1)), -1)
    return y2[..., ext:-ext]


if __name__ == "__main__":
    # deterministic input (batch=2, channels=4, seq_len=16)
    key = jax.random.PRNGKey(0)
    x = jax.random.normal(key, (2, 4, 16), dtype=jnp.float32)

    fwd = jax.jit(base_filter1d_forward)

    # deterministic "parameter": normalized Gaussian taps (subclasses of
    # BaseFilter1D build self.kernel in init_kernel(); we build one here).
    # Test both an odd and an even filter length.
    for K in (9, 8):
        sigma = 2.0
        taps = jnp.exp(
            -0.5 * ((jnp.arange(K, dtype=jnp.float32) - (K - 1) / 2.0)
                    / sigma) ** 2)
        taps = taps / jnp.sum(taps)

        out = jax.block_until_ready(fwd(x, taps))
        ref = jax.block_until_ready(_ref_forward(x, taps))
        assert out.shape == x.shape
        err = float(jnp.max(jnp.abs(out - ref)))
        assert jnp.allclose(out, ref, atol=1e-5, rtol=1e-5), (
            f"K={K}: max abs diff = {err}")

    print("KERNEL_OK")
</pallas_src>

<mosaic_0001>
module attributes {stable_mosaic.version = 11 : i64} {
  func.func @_filtfilt_kernel(%arg0: i32, %arg1: memref<1x9xf32, #tpu.memory_space<smem>>, %arg2: memref<8x16xf32, #tpu.memory_space<vmem>>, %arg3: memref<8x4xf32, #tpu.memory_space<vmem>>, %arg4: memref<8x4xf32, #tpu.memory_space<vmem>>, %arg5: memref<8x128xf32, #tpu.memory_space<vmem>>, %arg6: memref<8x144xf32, #tpu.memory_space<vmem>>) attributes {dimension_semantics = [#tpu.dimension_semantics<parallel>], iteration_bounds = array<i64: 1>, scalar_prefetch = 0 : i64, scratch_operands = 1 : i64, tpu.core_type = #tpu.core_type<tc>, window_params = [{transform_indices = @transform_0, window_bounds = array<i64: 1, 9>}, {transform_indices = @transform_1, window_bounds = array<i64: 8, 16>}, {transform_indices = @transform_2, window_bounds = array<i64: 8, 4>}, {transform_indices = @transform_3, window_bounds = array<i64: 8, 4>}, {transform_indices = @transform_4, window_bounds = array<i64: 8, 128>}]} {
    %cst = arith.constant 0.000000e+00 : f32
    %0 = vector.broadcast %cst : f32 to vector<8x4xf32>
    %c0 = arith.constant 0 : index
    %c0_0 = arith.constant 0 : index
    %1 = vector.load %arg6[%c0, %c0_0] : memref<8x144xf32, #tpu.memory_space<vmem>>, vector<8x4xf32>
    tpu.vector_store %arg6[%c0, %c0_0], %0 {strides = array<i32>} : memref<8x144xf32, #tpu.memory_space<vmem>>, vector<8x4xf32>,
    %c0_1 = arith.constant 0 : index
    %c0_2 = arith.constant 0 : index
    %2 = vector.load %arg3[%c0_1, %c0_2] : memref<8x4xf32, #tpu.memory_space<vmem>>, vector<8x4xf32>
    %c0_3 = arith.constant 0 : index
    %c4 = arith.constant 4 : index
    %3 = vector.load %arg6[%c0_3, %c4] : memref<8x144xf32, #tpu.memory_space<vmem>>, vector<8x4xf32>
    tpu.vector_store %arg6[%c0_3, %c4], %2 {strides = array<i32>} : memref<8x144xf32, #tpu.memory_space<vmem>>, vector<8x4xf32>,
    %c0_4 = arith.constant 0 : index
    %c0_5 = arith.constant 0 : index
    %4 = vector.load %arg2[%c0_4, %c0_5] : memref<8x16xf32, #tpu.memory_space<vmem>>, vector<8x16xf32>
    %c0_6 = arith.constant 0 : index
    %c8 = arith.constant 8 : index
    %5 = vector.load %arg6[%c0_6, %c8] : memref<8x144xf32, #tpu.memory_space<vmem>>, vector<8x16xf32>
    tpu.vector_store %arg6[%c0_6, %c8], %4 {strides = array<i32>} : memref<8x144xf32, #tpu.memory_space<vmem>>, vector<8x16xf32>,
    %c0_7 = arith.constant 0 : index
    %c0_8 = arith.constant 0 : index
    %6 = vector.load %arg4[%c0_7, %c0_8] : memref<8x4xf32, #tpu.memory_space<vmem>>, vector<8x4xf32>
    %c0_9 = arith.constant 0 : index
    %c24 = arith.constant 24 : index
    %7 = vector.load %arg6[%c0_9, %c24] : memref<8x144xf32, #tpu.memory_space<vmem>>, vector<8x4xf32>
    tpu.vector_store %arg6[%c0_9, %c24], %6 {strides = array<i32>} : memref<8x144xf32, #tpu.memory_space<vmem>>, vector<8x4xf32>,
    %cst_10 = arith.constant 0.000000e+00 : f32
    %8 = vector.broadcast %cst_10 : f32 to vector<8x116xf32>
    %c0_11 = arith.constant 0 : index
    %c28 = arith.constant 28 : index
    %9 = vector.load %arg6[%c0_11, %c28] : memref<8x144xf32, #tpu.memory_space<vmem>>, vector<8x116xf32>
    tpu.vector_store %arg6[%c0_11, %c28], %8 {strides = array<i32>} : memref<8x144xf32, #tpu.memory_space<vmem>>, vector<8x116xf32>,
    %c0_12 = arith.constant 0 : index
    %c0_13 = arith.constant 0 : index
    %10 = vector.load %arg6[%c0_12, %c0_13] : memref<8x144xf32, #tpu.memory_space<vmem>>, vector<8x144xf32>
    %c0_14 = arith.constant 0 : index
    %c0_15 = arith.constant 0 : index
    %11 = memref.load %arg1[%c0_14, %c0_15] : memref<1x9xf32, #tpu.memory_space<smem>>
    %12 = vector.extract_strided_slice %10 {offsets = [0, 0], sizes = [8, 136], strides = [1, 1]} : vector<8x144xf32> to vector<8x136xf32>
    %13 = vector.broadcast %11 : f32 to vector<8x136xf32>
    %14 = arith.mulf %13, %12 : vector<8x136xf32>
    %c0_16 = arith.constant 0 : index
    %c1 = arith.constant 1 : index
    %15 = memref.load %arg1[%c0_16, %c1] : memref<1x9xf32, #tpu.memory_space<smem>>
    %16 = vector.extract_strided_slice %10 {offsets = [0, 1], sizes = [8, 136], strides = [1, 1]} : vector<8x144xf32> to vector<8x136xf32>
    %17 = vector.broadcast %15 : f32 to vector<8x136xf32>
    %18 = arith.mulf %17, %16 : vector<8x136xf32>
    %19 = arith.addf %14, %18 : vector<8x136xf32>
    %c0_17 = arith.constant 0 : index
    %c2 = arith.constant 2 : index
    %20 = memref.load %arg1[%c0_17, %c2] : memref<1x9xf32, #tpu.memory_space<smem>>
    %21 = vector.extract_strided_slice %10 {offsets = [0, 2], sizes = [8, 136], strides = [1, 1]} : vector<8x144xf32> to vector<8x136xf32>
    %22 = vector.broadcast %20 : f32 to vector<8x136xf32>
    %23 = arith.mulf %22, %21 : vector<8x136xf32>
    %24 = arith.addf %19, %23 : vector<8x136xf32>
    %c0_18 = arith.constant 0 : index
    %c3 = arith.constant 3 : index
    %25 = memref.load %arg1[%c0_18, %c3] : memref<1x9xf32, #tpu.memory_space<smem>>
    %26 = vector.extract_strided_slice %10 {offsets = [0, 3], sizes = [8, 136], strides = [1, 1]} : vector<8x144xf32> to vector<8x136xf32>
    %27 = vector.broadcast %25 : f32 to vector<8x136xf32>
    %28 = arith.mulf %27, %26 : vector<8x136xf32>
    %29 = arith.addf %24, %28 : vector<8x136xf32>
    %c0_19 = arith.constant 0 : index
    %c4_20 = arith.constant 4 : index
    %30 = memref.load %arg1[%c0_19, %c4_20] : memref<1x9xf32, #tpu.memory_space<smem>>
    %31 = vector.extract_strided_slice %10 {offsets = [0, 4], sizes = [8, 136], strides = [1, 1]} : vector<8x144xf32> to vector<8x136xf32>
    %32 = vector.broadcast %30 : f32 to vector<8x136xf32>
    %33 = arith.mulf %32, %31 : vector<8x136xf32>
    %34 = arith.addf %29, %33 : vector<8x136xf32>
    %c0_21 = arith.constant 0 : index
    %c5 = arith.constant 5 : index
    %35 = memref.load %arg1[%c0_21, %c5] : memref<1x9xf32, #tpu.memory_space<smem>>
    %36 = vector.extract_strided_slice %10 {offsets = [0, 5], sizes = [8, 136], strides = [1, 1]} : vector<8x144xf32> to vector<8x136xf32>
    %37 = vector.broadcast %35 : f32 to vector<8x136xf32>
    %38 = arith.mulf %37, %36 : vector<8x136xf32>
    %39 = arith.addf %34, %38 : vector<8x136xf32>
    %c0_22 = arith.constant 0 : index
    %c6 = arith.constant 6 : index
    %40 = memref.load %arg1[%c0_22, %c6] : memref<1x9xf32, #tpu.memory_space<smem>>
    %41 = vector.extract_strided_slice %10 {offsets = [0, 6], sizes = [8, 136], strides = [1, 1]} : vector<8x144xf32> to vector<8x136xf32>
    %42 = vector.broadcast %40 : f32 to vector<8x136xf32>
    %43 = arith.mulf %42, %41 : vector<8x136xf32>
    %44 = arith.addf %39, %43 : vector<8x136xf32>
    %c0_23 = arith.constant 0 : index
    %c7 = arith.constant 7 : index
    %45 = memref.load %arg1[%c0_23, %c7] : memref<1x9xf32, #tpu.memory_space<smem>>
    %46 = vector.extract_strided_slice %10 {offsets = [0, 7], sizes = [8, 136], strides = [1, 1]} : vector<8x144xf32> to vector<8x136xf32>
    %47 = vector.broadcast %45 : f32 to vector<8x136xf32>
    %48 = arith.mulf %47, %46 : vector<8x136xf32>
    %49 = arith.addf %44, %48 : vector<8x136xf32>
    %c0_24 = arith.constant 0 : index
    %c8_25 = arith.constant 8 : index
    %50 = memref.load %arg1[%c0_24, %c8_25] : memref<1x9xf32, #tpu.memory_space<smem>>
    %51 = vector.extract_strided_slice %10 {offsets = [0, 8], sizes = [8, 136], strides = [1, 1]} : vector<8x144xf32> to vector<8x136xf32>
    %52 = vector.broadcast %50 : f32 to vector<8x136xf32>
    %53 = arith.mulf %52, %51 : vector<8x136xf32>
    %54 = arith.addf %49, %53 : vector<8x136xf32>
    %c0_26 = arith.constant 0 : index
    %c8_27 = arith.constant 8 : index
    %55 = memref.load %arg1[%c0_26, %c8_27] : memref<1x9xf32, #tpu.memory_space<smem>>
    %56 = vector.extract_strided_slice %54 {offsets = [0, 0], sizes = [8, 128], strides = [1, 1]} : vector<8x136xf32> to vector<8x128xf32>
    %57 = vector.broadcast %55 : f32 to vector<8x128xf32>
    %58 = arith.mulf %57, %56 : vector<8x128xf32>
    %c0_28 = arith.constant 0 : index
    %c7_29 = arith.constant 7 : index
    %59 = memref.load %arg1[%c0_28, %c7_29] : memref<1x9xf32, #tpu.memory_space<smem>>
    %60 = vector.extract_strided_slice %54 {offsets = [0, 1], sizes = [8, 128], strides = [1, 1]} : vector<8x136xf32> to vector<8x128xf32>
    %61 = vector.broadcast %59 : f32 to vector<8x128xf32>
    %62 = arith.mulf %61, %60 : vector<8x128xf32>
    %63 = arith.addf %58, %62 : vector<8x128xf32>
    %c0_30 = arith.constant 0 : index
    %c6_31 = arith.constant 6 : index
    %64 = memref.load %arg1[%c0_30, %c6_31] : memref<1x9xf32, #tpu.memory_space<smem>>
    %65 = vector.extract_strided_slice %54 {offsets = [0, 2], sizes = [8, 128], strides = [1, 1]} : vector<8x136xf32> to vector<8x128xf32>
    %66 = vector.broadcast %64 : f32 to vector<8x128xf32>
    %67 = arith.mulf %66, %65 : vector<8x128xf32>
    %68 = arith.addf %63, %67 : vector<8x128xf32>
    %c0_32 = arith.constant 0 : index
    %c5_33 = arith.constant 5 : index
    %69 = memref.load %arg1[%c0_32, %c5_33] : memref<1x9xf32, #tpu.memory_space<smem>>
    %70 = vector.extract_strided_slice %54 {offsets = [0, 3], sizes = [8, 128], strides = [1, 1]} : vector<8x136xf32> to vector<8x128xf32>
    %71 = vector.broadcast %69 : f32 to vector<8x128xf32>
    %72 = arith.mulf %71, %70 : vector<8x128xf32>
    %73 = arith.addf %68, %72 : vector<8x128xf32>
    %c0_34 = arith.constant 0 : index
    %c4_35 = arith.constant 4 : index
    %74 = memref.load %arg1[%c0_34, %c4_35] : memref<1x9xf32, #tpu.memory_space<smem>>
    %75 = vector.extract_strided_slice %54 {offsets = [0, 4], sizes = [8, 128], strides = [1, 1]} : vector<8x136xf32> to vector<8x128xf32>
    %76 = vector.broadcast %74 : f32 to vector<8x128xf32>
    %77 = arith.mulf %76, %75 : vector<8x128xf32>
    %78 = arith.addf %73, %77 : vector<8x128xf32>
    %c0_36 = arith.constant 0 : index
    %c3_37 = arith.constant 3 : index
    %79 = memref.load %arg1[%c0_36, %c3_37] : memref<1x9xf32, #tpu.memory_space<smem>>
    %80 = vector.extract_strided_slice %54 {offsets = [0, 5], sizes = [8, 128], strides = [1, 1]} : vector<8x136xf32> to vector<8x128xf32>
    %81 = vector.broadcast %79 : f32 to vector<8x128xf32>
    %82 = arith.mulf %81, %80 : vector<8x128xf32>
    %83 = arith.addf %78, %82 : vector<8x128xf32>
    %c0_38 = arith.constant 0 : index
    %c2_39 = arith.constant 2 : index
    %84 = memref.load %arg1[%c0_38, %c2_39] : memref<1x9xf32, #tpu.memory_space<smem>>
    %85 = vector.extract_strided_slice %54 {offsets = [0, 6], sizes = [8, 128], strides = [1, 1]} : vector<8x136xf32> to vector<8x128xf32>
    %86 = vector.broadcast %84 : f32 to vector<8x128xf32>
    %87 = arith.mulf %86, %85 : vector<8x128xf32>
    %88 = arith.addf %83, %87 : vector<8x128xf32>
    %c0_40 = arith.constant 0 : index
    %c1_41 = arith.constant 1 : index
    %89 = memref.load %arg1[%c0_40, %c1_41] : memref<1x9xf32, #tpu.memory_space<smem>>
    %90 = vector.extract_strided_slice %54 {offsets = [0, 7], sizes = [8, 128], strides = [1, 1]} : vector<8x136xf32> to vector<8x128xf32>
    %91 = vector.broadcast %89 : f32 to vector<8x128xf32>
    %92 = arith.mulf %91, %90 : vector<8x128xf32>
    %93 = arith.addf %88, %92 : vector<8x128xf32>
    %c0_42 = arith.constant 0 : index
    %c0_43 = arith.constant 0 : index
    %94 = memref.load %arg1[%c0_42, %c0_43] : memref<1x9xf32, #tpu.memory_space<smem>>
    %95 = vector.extract_strided_slice %54 {offsets = [0, 8], sizes = [8, 128], strides = [1, 1]} : vector<8x136xf32> to vector<8x128xf32>
    %96 = vector.broadcast %94 : f32 to vector<8x128xf32>
    %97 = arith.mulf %96, %95 : vector<8x128xf32>
    %98 = arith.addf %93, %97 : vector<8x128xf32>
    %c0_44 = arith.constant 0 : index
    %c0_45 = arith.constant 0 : index
    %99 = vector.load %arg5[%c0_44, %c0_45] : memref<8x128xf32, #tpu.memory_space<vmem>>, vector<8x128xf32>
    tpu.vector_store %arg5[%c0_44, %c0_45], %98 {strides = array<i32>} : memref<8x128xf32, #tpu.memory_space<vmem>>, vector<8x128xf32>,
    return
  }
  func.func @transform_0(%arg0: i32) -> (i32, i32) {
    %c0_i32 = arith.constant 0 : i32
    %c0_i32_0 = arith.constant 0 : i32
    %c0_i32_1 = arith.constant 0 : i32
    return %c0_i32, %c0_i32_0 : i32, i32
  }
  func.func @transform_1(%arg0: i32) -> (i32, i32) {
    %c0_i32 = arith.constant 0 : i32
    %c0_i32_0 = arith.constant 0 : i32
    return %arg0, %c0_i32 : i32, i32
  }
  func.func @transform_2(%arg0: i32) -> (i32, i32) {
    %c0_i32 = arith.constant 0 : i32
    %c0_i32_0 = arith.constant 0 : i32
    return %arg0, %c0_i32 : i32, i32
  }
  func.func @transform_3(%arg0: i32) -> (i32, i32) {
    %c0_i32 = arith.constant 0 : i32
    %c0_i32_0 = arith.constant 0 : i32
    return %arg0, %c0_i32 : i32, i32
  }
  func.func @transform_4(%arg0: i32) -> (i32, i32) {
    %c0_i32 = arith.constant 0 : i32
    %c0_i32_0 = arith.constant 0 : i32
    return %arg0, %c0_i32 : i32, i32
  }
}

</mosaic_0001>

<bundles_post_ra>
// kernel: base_filter1d_forward.1
= control target key start
LH: loop header
LB: loop body
LE: loop exit
PB: predicated region body
PF: predicated region fallthrough
CT: control target
= control target key end

     0   :  { %9 = vsyncpa [#allocation5], 0  ;;  %s521_s0 = inlined_call_operand.vmem [shape: f32[1,9], index: 0, kind: input, shape index: {}]   ;;  %s522_s1 = inlined_call_operand.vmem [shape: f32[8,16], index: 1, kind: input, shape index: {}]   ;;  %s523_s2 = inlined_call_operand.vmem [shape: f32[8,4], index: 2, kind: input, shape index: {}]   ;;  %s524_s3 = inlined_call_operand.vmem [shape: f32[8,4], index: 3, kind: input, shape index: {}]   ;;  %s525_s4 = inlined_call_operand.hbm [shape: f32[8,128], index: 4, kind: output, shape index: {}]  }
   0x1   :  { %10 = vsyncpa [#allocation4], 0  ;;  %s17_s17 = sshll.u32 %s521_s0, 4  ;;  %s18_s17 = int_to_ptr.vmem [resolvable:$true] %s17_s17 }
   0x2   :  { %s319_s18 = scalar_lea.vmem %s18_s17, 16  ;;  %p324_p1 = scmp.lt.s32.totalorder %s18_s17, %s18_s17 }
   0x3   :  { %p320_p0 = scmp.ne.s32.totalorder %s18_s17, %s319_s18  ;;  %p325_p2 = scmp.lt.s32.totalorder %s319_s18, %s319_s18 }
   0x5   :  { %p326_p3 = por %p325_p2, %p324_p1 }
   0x7   :  { %p327_p4 = pnand %p326_p3, %p320_p0 }
   0x9   :  { %330 = shalt.err (!%p327_p4)
}
   0xa   :  { %s357_s19 = smov [#allocation3]  }
   0xb   :  { %20 = dma.vmem_to_smem %s18_s17, 16, %s357_s19, [#allocation5]  }
   0xc   :  { %353 = dma.done.wait [#allocation5], 16  }
   0xd   :  { %354 = vsyncadd [#allocation5], 4294967280 }
   0xe   :  { %30 = sfence }
   0xf   :  { %v33_v0 = vld [vmem:[%s523_s2] sm:$0xff]  ;;  %s358_s0 = smov 4   ;;  %vm56_vm0 = vcmask 130048   ;;  %s297_s24 = sld [smem:[#allocation3 + $0x1]]  ;;  %vm31_vm1 = vcmask 31744   ;;  %v360_v3 = vmov 0.0  }
  0x10   :  { %v47_v1 = vld [vmem:[%s524_s3] sm:$0xff]  ;;  %35 = vrot.lane.b32.xlu0 %v33_v0, %s358_s0  ;;  %s359_s27 = smov 24   ;;  %57 = vst.msk [vmem:[#allocation2 + $0x8] sm:$0xff] %vm56_vm0, %v360_v3  ;;  %s298_s28 = sld [smem:[#allocation3 + $0x2]]  ;;  %vm38_vm2 = vcmask 64544   ;;  %vm45_vm3 = vcmask 195648  }
  0x11   :  { %v40_v2 = vld [vmem:[%s522_s1] sm:$0xff]  ;;  %49 = vrot.lane.b32.xlu1 %v47_v1, %s359_s27  ;;  %32 = vst.msk [vmem:[#allocation2] sm:$0xff] %vm31_vm1, %v360_v3  ;;  %s361_s2 = smov 8   ;;  %s299_s29 = sld [smem:[#allocation3 + $0x3]]  ;;  %vm52_vm4 = vcmask 228544   ;;  %vm54_vm5 = vcmask 1047776  }
  0x12   :  { %s300_s3 = sld [smem:[#allocation3 + $0x4]]  ;;  %s362_s30 = smov 127   ;;  %vm74_vm6 = vcmask 1039360   ;;  %vm90_vm7 = vcmask 1031168   ;;  %vm106_vm8 = vcmask 1022976   ;;  %vm122_vm9 = vcmask 1014784  }
  0x13   :  { %s301_s1 = sld [smem:[#allocation3 + $0x5]]  ;;  %s363_s5 = smov 126   ;;  %vm138_vm10 = vcmask 1006592   ;;  %vm154_vm11 = vcmask 998400   ;;  %vm170_vm12 = vcmask 990208   ;;  %vm186_vm13 = vcmask 982016  }
  0x14   :  { %42 = vrot.lane.b32.xlu0 %v40_v2, %s361_s2  ;;  %s302_s6 = sld [smem:[#allocation3 + $0x6]]  ;;  %s364_s7 = smov 125  }
  0x15   :  { %v408_v4 = vstv %s297_s24  ;;  %s303_s8 = sld [smem:[#allocation3 + $0x7]]  ;;  %s365_s9 = smov 124  }
  0x16   :  { %v410_v6 = vstv %s298_s28  ;;  %s304_s10 = sld [smem:[#allocation3 + $0x8]]  ;;  %s366_s11 = smov 123  }
  0x17   :  { %v59_v5 = vld [vmem:[#allocation2 + $0x8] sm:$0xff]  ;;  %v415_v9 = vstv %s299_s29  ;;  %s367_s12 = smov 122   ;;  %s368_s13 = smov 121  }
  0x18   :  { %v67_v7 = vmul.f32 %v408_v4, %v59_v5  ;;  %v83_v8 = vmul.f32 %v410_v6, %v59_v5  ;;  %v99_v10 = vmul.f32 %v415_v9, %v59_v5  ;;  %v419_v11 = vstv %s300_s3  ;;  %s369_s14 = smov 120   ;;  %s60_s15 = sld [smem:[#allocation3]] }
  0x19   :  { %v115_v12 = vmul.f32 %v419_v11, %v59_v5  ;;  %v423_v13 = vstv %s301_s1  ;;  %s370_s16 = smov [#allocation6]  }
  0x1a   :  { %72 = vrot.lane.b32.xlu0 %v67_v7, %s362_s30  ;;  %v131_v14 = vmul.f32 %v423_v13, %v59_v5  ;;  %v427_v15 = vstv %s302_s6  ;;  %s288_s17 = sshll.u32 %s370_s16, 4  ;;  %s289_s17 = int_to_ptr.vmem [resolvable:$true] %s288_s17 }
  0x1b   :  { %v147_v16 = vmul.f32 %v427_v15, %v59_v5  ;;  %v431_v17 = vstv %s303_s8  ;;  %s331_s18 = scalar_lea.vmem %s289_s17, 128  ;;  %p336_p6 = scmp.lt.s32.totalorder %s289_s17, %s289_s17 }
  0x1c   :  { %v163_v18 = vmul.f32 %v431_v17, %v59_v5  ;;  %v435_v19 = vstv %s304_s10  ;;  %p332_p5 = scmp.ne.s32.totalorder %s289_s17, %s331_s18  ;;  %p337_p7 = scmp.lt.s32.totalorder %s331_s18, %s331_s18 }
  0x1d   :  { %v179_v20 = vmul.f32 %v435_v19, %v59_v5 }
  0x1e   :  { %88 = vrot.lane.b32.xlu0 %v83_v8, %s363_s5  ;;  %v440_v24 = vstv %s60_s15  ;;  %p338_p8 = por %p337_p7, %p336_p6 }
  0x1f   :  { %v63_v25 = vmul.f32 %v440_v24, %v59_v5 }
  0x20   :  { %p339_p9 = pnand %p338_p8, %p332_p5 }
  0x22   :  { %104 = vrot.lane.b32.xlu0 %v99_v10, %s364_s7 }
  0x26   :  { %120 = vrot.lane.b32.xlu0 %v115_v12, %s365_s9 }
  0x2a   :  { %136 = vrot.lane.b32.xlu0 %v131_v14, %s366_s11 }
  0x2e   :  { %152 = vrot.lane.b32.xlu0 %v147_v16, %s367_s12 }
  0x32   :  { %168 = vrot.lane.b32.xlu0 %v163_v18, %s368_s13 }
  0x36   :  { %184 = vrot.lane.b32.xlu0 %v179_v20, %s369_s14 }
  0x82   :  { %v36_v21 = vpop.permute.xlu0 %35 }
  0x83   :  { %39 = vst.msk [vmem:[#allocation2] sm:$0xff] %vm38_vm2, %v36_v21  ;;  %v50_v22 = vpop.permute.xlu1 %49 }
  0x86   :  { %v43_v23 = vpop.permute.xlu0 %42 }
  0x87   :  { %46 = vst.msk [vmem:[#allocation2] sm:$0xff] %vm45_vm3, %v43_v23 }
  0x88   :  { %53 = vst.msk [vmem:[#allocation2] sm:$0xff] %vm52_vm4, %v50_v22 }
  0x89   :  { %55 = vst.msk [vmem:[#allocation2] sm:$0xff] %vm54_vm5, %v360_v3 }
  0x8c   :  { %v73_v26 = vpop.permute.xlu0 %72 }
  0x8d   :  { %v79_v27 = vadd.f32 %v73_v26, %v63_v25 }
  0x90   :  { %v58_v28 = vld [vmem:[#allocation2] sm:$0xff]  ;;  %v89_v30 = vpop.permute.xlu0 %88 }
  0x91   :  { %v66_v29 = vmul.f32 %v408_v4, %v58_v28  ;;  %v82_v31 = vmul.f32 %v410_v6, %v58_v28  ;;  %v95_v32 = vadd.f32 %v89_v30, %v79_v27  ;;  %v98_v35 = vmul.f32 %v415_v9, %v58_v28 }
  0x92   :  { %v114_v38 = vmul.f32 %v419_v11, %v58_v28  ;;  %v130_v41 = vmul.f32 %v423_v13, %v58_v28  ;;  %v146_v44 = vmul.f32 %v427_v15, %v58_v28  ;;  %v162_v47 = vmul.f32 %v431_v17, %v58_v28 }
  0x93   :  { %70 = vrot.lane.b32.xlu1 %v66_v29, %s362_s30  ;;  %v178_v50 = vmul.f32 %v435_v19, %v58_v28  ;;  %v62_v62 = vmul.f32 %v440_v24, %v58_v28 }
  0x94   :  { %v105_v33 = vpop.permute.xlu0 %104 }
  0x95   :  { %v111_v34 = vadd.f32 %v105_v33, %v95_v32 }
  0x97   :  { %86 = vrot.lane.b32.xlu1 %v82_v31, %s363_s5 }
  0x98   :  { %v121_v36 = vpop.permute.xlu0 %120 }
  0x99   :  { %v127_v37 = vadd.f32 %v121_v36, %v111_v34 }
  0x9b   :  { %102 = vrot.lane.b32.xlu1 %v98_v35, %s364_s7 }
  0x9c   :  { %v137_v39 = vpop.permute.xlu0 %136 }
  0x9d   :  { %v143_v40 = vadd.f32 %v137_v39, %v127_v37 }
  0x9f   :  { %118 = vrot.lane.b32.xlu1 %v114_v38, %s365_s9 }
  0xa0   :  { %v153_v42 = vpop.permute.xlu0 %152 }
  0xa1   :  { %v159_v43 = vadd.f32 %v153_v42, %v143_v40 }
  0xa3   :  { %134 = vrot.lane.b32.xlu1 %v130_v41, %s366_s11 }
  0xa4   :  { %v169_v45 = vpop.permute.xlu0 %168 }
  0xa5   :  { %v175_v46 = vadd.f32 %v169_v45, %v159_v43 }
  0xa7   :  { %150 = vrot.lane.b32.xlu1 %v146_v44, %s367_s12 }
  0xa8   :  { %v185_v48 = vpop.permute.xlu0 %184 }
  0xa9   :  { %v191_v49 = vadd.f32 %v185_v48, %v175_v46 }
  0xab   :  { %166 = vrot.lane.b32.xlu1 %v162_v47, %s368_s13  ;;  %v194_v51 = vmul.f32 %v191_v49, %v431_v17  ;;  %v205_v52 = vmul.f32 %v191_v49, %v427_v15  ;;  %v216_v53 = vmul.f32 %v191_v49, %v423_v13  ;;  %v227_v54 = vmul.f32 %v191_v49, %v419_v11 }
  0xac   :  { %v238_v55 = vmul.f32 %v191_v49, %v415_v9  ;;  %v249_v56 = vmul.f32 %v191_v49, %v410_v6  ;;  %v260_v57 = vmul.f32 %v191_v49, %v408_v4  ;;  %v271_v58 = vmul.f32 %v191_v49, %v440_v24 }
  0xad   :  { %199 = vrot.lane.b32.xlu0 %v194_v51, %s362_s30 }
  0xaf   :  { %182 = vrot.lane.b32.xlu1 %v178_v50, %s369_s14 }
  0xb1   :  { %210 = vrot.lane.b32.xlu0 %v205_v52, %s363_s5 }
  0xb5   :  { %221 = vrot.lane.b32.xlu0 %v216_v53, %s364_s7 }
  0xb9   :  { %232 = vrot.lane.b32.xlu0 %v227_v54, %s365_s9 }
  0xbd   :  { %243 = vrot.lane.b32.xlu0 %v238_v55, %s366_s11 }
  0xc1   :  { %254 = vrot.lane.b32.xlu0 %v249_v56, %s367_s12 }
  0xc5   :  { %265 = vrot.lane.b32.xlu0 %v260_v57, %s368_s13 }
  0xc9   :  { %276 = vrot.lane.b32.xlu0 %v271_v58, %s369_s14 }
 0x105   :  { %v71_v59 = vpop.permute.xlu1 %70 }
 0x106   :  { %v75_v0 = vsel %vm74_vm6, %v71_v59, %v73_v26 }
 0x107   :  { %v78_v2 = vadd.f32 %v75_v0, %v62_v62 }
 0x109   :  { %v87_v60 = vpop.permute.xlu1 %86 }
 0x10a   :  { %v91_v1 = vsel %vm90_vm7, %v87_v60, %v89_v30 }
 0x10b   :  { %v94_v7 = vadd.f32 %v91_v1, %v78_v2 }
 0x10d   :  { %v103_v61 = vpop.permute.xlu1 %102 }
 0x10e   :  { %v107_v5 = vsel %vm106_vm8, %v103_v61, %v105_v33 }
 0x10f   :  { %v110_v10 = vadd.f32 %v107_v5, %v94_v7 }
 0x111   :  { %v119_v63 = vpop.permute.xlu1 %118 }
 0x112   :  { %v123_v8 = vsel %vm122_vm9, %v119_v63, %v121_v36 }
 0x113   :  { %v126_v16 = vadd.f32 %v123_v8, %v110_v10 }
 0x115   :  { %v135_v3 = vpop.permute.xlu1 %134 }
 0x116   :  { %v139_v14 = vsel %vm138_vm10, %v135_v3, %v137_v39 }
 0x117   :  { %v142_v20 = vadd.f32 %v139_v14, %v126_v16 }
 0x119   :  { %v151_v12 = vpop.permute.xlu1 %150 }
 0x11a   :  { %v155_v18 = vsel %vm154_vm11, %v151_v12, %v153_v42 }
 0x11b   :  { %v158_v23 = vadd.f32 %v155_v18, %v142_v20 }
 0x11d   :  { %v167_v21 = vpop.permute.xlu1 %166 }
 0x11e   :  { %v171_v22 = vsel %vm170_vm12, %v167_v21, %v169_v45 }
 0x11f   :  { %v174_v25 = vadd.f32 %v171_v22, %v158_v23  ;;  %v200_v34 = vpop.permute.xlu0 %199 }
 0x121   :  { %v183_v26 = vpop.permute.xlu1 %182 }
 0x122   :  { %v187_v27 = vsel %vm186_vm13, %v183_v26, %v185_v48 }
 0x123   :  { %v190_v28 = vadd.f32 %v187_v27, %v174_v25 }
 0x125   :  { %v193_v29 = vmul.f32 %v190_v28, %v431_v17  ;;  %v204_v30 = vmul.f32 %v190_v28, %v427_v15  ;;  %v215_v31 = vmul.f32 %v190_v28, %v423_v13  ;;  %v226_v32 = vmul.f32 %v190_v28, %v419_v11  ;;  %v211_v11 = vpop.permute.xlu0 %210 }
 0x126   :  { %v237_v33 = vmul.f32 %v190_v28, %v415_v9  ;;  %v248_v17 = vmul.f32 %v190_v28, %v410_v6  ;;  %v259_v15 = vmul.f32 %v190_v28, %v408_v4  ;;  %v270_v13 = vmul.f32 %v190_v28, %v440_v24 }
 0x127   :  { %197 = vrot.lane.b32.xlu1 %v193_v29, %s362_s30  ;;  %v192_v41 = vmul.f32 %v190_v28, %v435_v19 }
 0x129   :  { %v222_v35 = vpop.permute.xlu0 %221 }
 0x12b   :  { %208 = vrot.lane.b32.xlu1 %v204_v30, %s363_s5 }
 0x12d   :  { %v233_v37 = vpop.permute.xlu0 %232 }
 0x12f   :  { %219 = vrot.lane.b32.xlu1 %v215_v31, %s364_s7 }
 0x131   :  { %v244_v39 = vpop.permute.xlu0 %243 }
 0x133   :  { %230 = vrot.lane.b32.xlu1 %v226_v32, %s365_s9 }
 0x135   :  { %v255_v42 = vpop.permute.xlu0 %254 }
 0x137   :  { %241 = vrot.lane.b32.xlu1 %v237_v33, %s366_s11 }
 0x139   :  { %v266_v50 = vpop.permute.xlu0 %265 }
 0x13b   :  { %252 = vrot.lane.b32.xlu1 %v248_v17, %s367_s12 }
 0x13d   :  { %v277_v56 = vpop.permute.xlu0 %276 }
 0x13f   :  { %263 = vrot.lane.b32.xlu1 %v259_v15, %s368_s13 }
 0x143   :  { %274 = vrot.lane.b32.xlu1 %v270_v13, %s369_s14 }
 0x199   :  { %v198_v36 = vpop.permute.xlu1 %197 }
 0x19a   :  { %v201_v6 = vsel %vm74_vm6, %v198_v36, %v200_v34 }
 0x19b   :  { %v203_v43 = vadd.f32 %v201_v6, %v192_v41 }
 0x19d   :  { %v209_v9 = vpop.permute.xlu1 %208 }
 0x19e   :  { %v212_v4 = vsel %vm90_vm7, %v209_v9, %v211_v11 }
 0x19f   :  { %v214_v45 = vadd.f32 %v212_v4, %v203_v43 }
 0x1a1   :  { %v220_v38 = vpop.permute.xlu1 %219 }
 0x1a2   :  { %v223_v44 = vsel %vm106_vm8, %v220_v38, %v222_v35 }
 0x1a3   :  { %v225_v47 = vadd.f32 %v223_v44, %v214_v45 }
 0x1a5   :  { %v231_v40 = vpop.permute.xlu1 %230 }
 0x1a6   :  { %v234_v46 = vsel %vm122_vm9, %v231_v40, %v233_v37 }
 0x1a7   :  { %v236_v51 = vadd.f32 %v234_v46, %v225_v47 }
 0x1a9   :  { %v242_v24 = vpop.permute.xlu1 %241 }
 0x1aa   :  { %v245_v49 = vsel %vm138_vm10, %v242_v24, %v244_v39 }
 0x1ab   :  { %v247_v53 = vadd.f32 %v245_v49, %v236_v51 }
 0x1ad   :  { %v253_v48 = vpop.permute.xlu1 %252 }
 0x1ae   :  { %v256_v52 = vsel %vm154_vm11, %v253_v48, %v255_v42 }
 0x1af   :  { %v258_v55 = vadd.f32 %v256_v52, %v247_v53 }
 0x1b1   :  { %v264_v19 = vpop.permute.xlu1 %263 }
 0x1b2   :  { %v267_v54 = vsel %vm170_vm12, %v264_v19, %v266_v50 }
 0x1b3   :  { %v269_v57 = vadd.f32 %v267_v54, %v258_v55 }
 0x1b5   :  { %v275_v58 = vpop.permute.xlu1 %274 }
 0x1b6   :  { %v278_v59 = vsel %vm186_vm13, %v275_v58, %v277_v56 }
 0x1b7   :  { %v280_v60 = vadd.f32 %v278_v59, %v269_v57 }
 0x1b9   :  { %281 = vst [vmem:[#allocation6] sm:$0xff] %v280_v60 }
 0x1ba   :  { %342 = shalt.err (!%p339_p9)
}
 0x1bb   :  { %s343_s21 = scalar_lea.hbm %s525_s4, 128 }
 0x1bc   :  { %p344_p10 = scmp.ne.s32.totalorder %s525_s4, %s343_s21  ;;  %p347_p11 = scmp.lt.u32.totalorder %s343_s21, %s525_s4 }
 0x1be   :  { %p349_p12 = pnand %p347_p11, %p344_p10 }
 0x1c0   :  { %352 = shalt.err (!%p349_p12)
}
 0x1c1   :  { %291 = dma.vmem_to_hbm [thread:$0]  %s289_s17, 128, %s525_s4, [#allocation4]  }
 0x1c2   :  { %355 = dma.done.wait [#allocation4], 128  }
 0x1c3   :  { %356 = vsyncadd [#allocation4], 4294967168 }
 0x1c4   :  { %295 = vsyncpa [#allocation4], 1 }
 0x1c5   :  { %296 = vsyncpa [#allocation5], 1 }

</bundles_post_ra>
